<compile_context>
chip_gen: v6e
topology: v6e:2x2x1
jax: 0.10.0
libtpu: 0.0.40
codegen_flags: <defaults>
</compile_context>

<pallas_src>
import functools

import jax
import jax.numpy as jnp
from jax.experimental import pallas as pl
from jax.experimental.pallas import tpu as pltpu


def _gem_kernel(p_ref, x_ref, o_ref, acc_ref, *, eps, inv_hw, reduce_axis):
    """One (B-tile, C-tile, HW-tile) step of GeM pooling.

    x_ref block is (tile_b, tile_c, tile_hw) for NCHW layout (reduce_axis=2)
    or (tile_b, tile_hw, tile_c) for NHWC layout (reduce_axis=1).
    acc_ref is a persistent f32 (tile_b, tile_c) partial-sum accumulator.
    """
    k = pl.program_id(2)

    @pl.when(k == 0)
    def _init():
        acc_ref[...] = jnp.zeros_like(acc_ref)

    p = p_ref[0]                                   # scalar learnable p (SMEM)
    x = x_ref[...].astype(jnp.float32)             # keep transcendentals in f32
    x = jnp.maximum(x, eps)                        # clamp(min=eps) -> x > 0
    # x**p with a runtime, non-integer exponent: exp(p * log(x)) on the EUP.
    xp = jnp.exp(p * jnp.log(x))
    acc_ref[...] += jnp.sum(xp, axis=reduce_axis)  # partial sum over this HW tile

    @pl.when(k == pl.num_programs(2) - 1)
    def _finish():
        pooled = acc_ref[...] * inv_hw             # mean over H*W
        o_ref[...] = jnp.exp(jnp.log(pooled) * (1.0 / p)).astype(o_ref.dtype)


def _vmem_capacity_bytes():
    """Physical VMEM of the current generation; conservative fallback = v7x."""
    try:
        info = pltpu.get_tpu_info()
        cap = int(getattr(info, "vmem_capacity_bytes", 0))
        if cap > 0:
            return cap
    except Exception:
        pass
    return 64 * 1024 * 1024


def _candidate_tiles(dim, unit, cap=None):
    """Divisors of `dim` that are multiples of `unit` (descending), with the
    full dim as the always-legal fallback when no aligned divisor exists."""
    hi = dim if cap is None else min(dim, cap)
    cands = sorted({t for t in range(unit, hi + 1, unit) if dim % t == 0},
                   reverse=True)
    if not cands:
        cands = [dim]   # full dim: legal block extent even if not unit-aligned
    return cands


def _select_tiles(B, C, hw, itemsize, budget_bytes, hw_unit):
    """Largest (tile_b, tile_c, tile_hw) whose streamed-x footprint fits budget.

    Footprint model per grid step: 2 pipeline buffers of the input dtype plus
    ~3 full-tile f32 temporaries (upcast, x^p, reduce input) inside the kernel.
    """
    per_elem = 2 * itemsize + 3 * 4
    b_cands = _candidate_tiles(B, 8, 64)
    c_cands = _candidate_tiles(C, 128, 1024)
    hw_cands = _candidate_tiles(hw, hw_unit, None)

    best = None       # biggest block that fits the budget
    fallback = None   # smallest block overall (used only if nothing fits)
    for tb in b_cands:
        for tc in c_cands:
            for thw in hw_cands:
                cost = tb * tc * thw * per_elem
                key = (tb * tc * thw, tc, thw, tb)
                if cost <= budget_bytes and (best is None or key > best[0]):
                    best = (key, (tb, tc, thw))
                if fallback is None or key < fallback[0]:
                    fallback = (key, (tb, tc, thw))

    tb, tc, thw = (best or fallback)[1]

    # v7x has 2 TensorCores sharing work via the parallel grid axes; avoid
    # collapsing both of them to a single step when we can split legally.
    if (B // tb) * (C // tc) == 1:
        if tc % 256 == 0:      # split C: halves stay 128-aligned divisors
            tc //= 2
        elif tb % 16 == 0:     # else split B: halves stay 8-aligned divisors
            tb //= 2
    return tb, tc, thw


def gem_pooling(x, p, *, eps=1e-6, channels_last=False):
    """Pallas GeMPooling forward.

    x: (B, C, H, W) by default, or (B, H, W, C) with channels_last=True.
    p: shape-(1,) learnable exponent.  Returns (B, C) in x.dtype.
    """
    if channels_last:
        B, H, W, C = x.shape
    else:
        B, C, H, W = x.shape
    hw = H * W
    itemsize = jnp.dtype(x.dtype).itemsize

    vmem_cap = _vmem_capacity_bytes()
    budget = vmem_cap // 4                       # cap the streamed-x footprint
    hw_unit = 8 if channels_last else 128        # sublane vs lane alignment
    tile_b, tile_c, tile_hw = _select_tiles(B, C, hw, itemsize, budget, hw_unit)

    if channels_last:
        x3 = x.reshape(B, hw, C)                 # C on lanes: 100% lane density
        block = (tile_b, tile_hw, tile_c)
        x_index = lambda i, j, k: (i, k, j)
        reduce_axis = 1
    else:
        x3 = x.reshape(B, C, hw)                 # no wrapper transpose / upcast
        block = (tile_b, tile_c, tile_hw)
        x_index = lambda i, j, k: (i, j, k)
        reduce_axis = 2

    grid = (B // tile_b, C // tile_c, hw // tile_hw)

    # Scoped-VMEM limit sized to the chosen tiles (defaults are 16/32 MiB).
    x_block = tile_b * tile_c * tile_hw
    est = (2 * x_block * itemsize                # double-buffered x stream
           + 3 * x_block * 4                     # f32 in-kernel temporaries
           + 2 * tile_b * tile_c * itemsize      # double-buffered output
           + tile_b * tile_c * 4)                # f32 accumulator scratch
    vmem_limit = int(min(vmem_cap, max(32 * 1024 * 1024, 2 * est)))

    kernel = functools.partial(_gem_kernel, eps=float(eps), inv_hw=1.0 / hw,
                               reduce_axis=reduce_axis)

    return pl.pallas_call(
        kernel,
        out_shape=jax.ShapeDtypeStruct((B, C), x.dtype),
        grid=grid,
        in_specs=[
            pl.BlockSpec(memory_space=pltpu.MemorySpace.SMEM),   # scalar p
            pl.BlockSpec(block, x_index),                        # x tiles
        ],
        out_specs=pl.BlockSpec((tile_b, tile_c), lambda i, j, k: (i, j)),
        scratch_shapes=[pltpu.VMEM((tile_b, tile_c), jnp.float32)],
        compiler_params=pltpu.CompilerParams(
            dimension_semantics=("parallel", "parallel", "arbitrary"),
            vmem_limit_bytes=vmem_limit),
    )(p.astype(jnp.float32), x3)


def _gem_ref_nchw(x, p, eps=1e-6):
    """Pure-JAX reference mirroring the PyTorch forward (NCHW)."""
    xp = jnp.maximum(x.astype(jnp.float32), eps) ** p[0]
    pooled = jnp.mean(xp, axis=(2, 3))
    return (pooled ** (1.0 / p[0])).astype(x.dtype)


def _gem_ref_nhwc(x, p, eps=1e-6):
    """Pure-JAX reference for channels-last inputs (NHWC)."""
    xp = jnp.maximum(x.astype(jnp.float32), eps) ** p[0]
    pooled = jnp.mean(xp, axis=(1, 2))
    return (pooled ** (1.0 / p[0])).astype(x.dtype)


if __name__ == "__main__":
    key = jax.random.PRNGKey(0)
    k1, k2, k3 = jax.random.split(key, 3)
    p = jnp.ones((1,), jnp.float32) * 3.0        # GeMPooling default p=3.0

    # 1) Small shape consistent with the module: batch=2, channels=4, 16x16.
    B, C, H, W = 2, 4, 16, 16
    x = jax.random.normal(k1, (B, C, H, W), jnp.float32)
    out = jax.block_until_ready(gem_pooling(x, p))
    ref = _gem_ref_nchw(x, p)
    assert out.shape == (B, C)
    assert jnp.allclose(out, ref, atol=1e-4, rtol=1e-4)

    # 2) Larger shape exercising the tiled grid + H*W-accumulator path.
    B2, C2, H2, W2 = 8, 256, 32, 32
    x2 = jax.random.normal(k2, (B2, C2, H2, W2), jnp.float32)
    out2 = jax.block_until_ready(gem_pooling(x2, p))
    ref2 = _gem_ref_nchw(x2, p)
    assert out2.shape == (B2, C2)
    assert jnp.allclose(out2, ref2, atol=1e-4, rtol=1e-4)

    # 3) Channels-last (NHWC) path: full lane density when H*W (7x7=49) is not
    #    128-aligned — typical GeM backbone output.
    B3, H3, W3, C3 = 4, 7, 7, 128
    x3 = jax.random.normal(k3, (B3, H3, W3, C3), jnp.float32)
    out3 = jax.block_until_ready(gem_pooling(x3, p, channels_last=True))
    ref3 = _gem_ref_nhwc(x3, p)
    assert out3.shape == (B3, C3)
    assert jnp.allclose(out3, ref3, atol=1e-4, rtol=1e-4)

    print("KERNEL_OK")
</pallas_src>

<mosaic_0001>
module attributes {stable_mosaic.version = 11 : i64} {
  func.func @_gem_kernel(%arg0: i32, %arg1: i32, %arg2: i32, %arg3: memref<1xf32, #tpu.memory_space<smem>>, %arg4: memref<2x4x256xf32, #tpu.memory_space<vmem>>, %arg5: memref<2x4xf32, #tpu.memory_space<vmem>>, %arg6: memref<2x4xf32, #tpu.memory_space<vmem>>) attributes {dimension_semantics = [#tpu.dimension_semantics<parallel>, #tpu.dimension_semantics<parallel>, #tpu.dimension_semantics<arbitrary>], iteration_bounds = array<i64: 1, 1, 1>, scalar_prefetch = 0 : i64, scratch_operands = 1 : i64, tpu.core_type = #tpu.core_type<tc>, window_params = [{transform_indices = @transform_0, window_bounds = array<i64: 1>}, {transform_indices = @transform_1, window_bounds = array<i64: 2, 4, 256>}, {transform_indices = @transform_2, window_bounds = array<i64: 2, 4>}]} {
    %c0_i32 = arith.constant 0 : i32
    %0 = arith.cmpi eq, %arg2, %c0_i32 : i32
    %1 = arith.extui %0 : i1 to i32
    %c0_i32_0 = arith.constant 0 : i32
    %2 = arith.cmpi ne, %1, %c0_i32_0 : i32
    scf.if %2 {
      %cst_11 = arith.constant 0.000000e+00 : f32
      %18 = vector.broadcast %cst_11 : f32 to vector<2x4xf32>
      %c0_12 = arith.constant 0 : index
      %c0_13 = arith.constant 0 : index
      %19 = vector.load %arg6[%c0_12, %c0_13] : memref<2x4xf32, #tpu.memory_space<vmem>>, vector<2x4xf32>
      tpu.vector_store %arg6[%c0_12, %c0_13], %18 {strides = array<i32>} : memref<2x4xf32, #tpu.memory_space<vmem>>, vector<2x4xf32>,
    } else {
    }
    %c0 = arith.constant 0 : index
    %3 = memref.load %arg3[%c0] : memref<1xf32, #tpu.memory_space<smem>>
    %c0_1 = arith.constant 0 : index
    %c0_2 = arith.constant 0 : index
    %c0_3 = arith.constant 0 : index
    %4 = vector.load %arg4[%c0_1, %c0_2, %c0_3] : memref<2x4x256xf32, #tpu.memory_space<vmem>>, vector<2x4x256xf32>
    %cst = arith.constant 9.99999997E-7 : f32
    %5 = vector.broadcast %cst : f32 to vector<2x4x256xf32>
    %6 = arith.maximumf %4, %5 : vector<2x4x256xf32>
    %7 = math.log %6 : vector<2x4x256xf32>
    %8 = vector.broadcast %3 : f32 to vector<2x4x256xf32>
    %9 = arith.mulf %8, %7 : vector<2x4x256xf32>
    %10 = math.exp %9 : vector<2x4x256xf32>
    %c0_4 = arith.constant 0 : index
    %c0_5 = arith.constant 0 : index
    %11 = vector.load %arg6[%c0_4, %c0_5] : memref<2x4xf32, #tpu.memory_space<vmem>>, vector<2x4xf32>
    %cst_6 = arith.constant dense<0.000000e+00> : vector<2x4xf32>
    %12 = vector.multi_reduction <add>, %10, %cst_6 [2] : vector<2x4x256xf32> to vector<2x4xf32>
    %13 = arith.addf %11, %12 : vector<2x4xf32>
    %c0_7 = arith.constant 0 : index
    %c0_8 = arith.constant 0 : index
    %14 = vector.load %arg6[%c0_7, %c0_8] : memref<2x4xf32, #tpu.memory_space<vmem>>, vector<2x4xf32>
    tpu.vector_store %arg6[%c0_7, %c0_8], %13 {strides = array<i32>} : memref<2x4xf32, #tpu.memory_space<vmem>>, vector<2x4xf32>,
    %c0_i32_9 = arith.constant 0 : i32
    %15 = arith.cmpi eq, %arg2, %c0_i32_9 : i32
    %16 = arith.extui %15 : i1 to i32
    %c0_i32_10 = arith.constant 0 : i32
    %17 = arith.cmpi ne, %16, %c0_i32_10 : i32
    scf.if %17 {
      %c0_11 = arith.constant 0 : index
      %c0_12 = arith.constant 0 : index
      %18 = vector.load %arg6[%c0_11, %c0_12] : memref<2x4xf32, #tpu.memory_space<vmem>>, vector<2x4xf32>
      %cst_13 = arith.constant 3.906250e-03 : f32
      %19 = vector.broadcast %cst_13 : f32 to vector<2x4xf32>
      %20 = arith.mulf %18, %19 : vector<2x4xf32>
      %21 = math.log %20 : vector<2x4xf32>
      %cst_14 = arith.constant 1.000000e+00 : f32
      %22 = arith.divf %cst_14, %3 : f32
      %23 = vector.broadcast %22 : f32 to vector<2x4xf32>
      %24 = arith.mulf %21, %23 : vector<2x4xf32>
      %25 = math.exp %24 : vector<2x4xf32>
      %c0_15 = arith.constant 0 : index
      %c0_16 = arith.constant 0 : index
      %26 = vector.load %arg5[%c0_15, %c0_16] : memref<2x4xf32, #tpu.memory_space<vmem>>, vector<2x4xf32>
      tpu.vector_store %arg5[%c0_15, %c0_16], %25 {strides = array<i32>} : memref<2x4xf32, #tpu.memory_space<vmem>>, vector<2x4xf32>,
    } else {
    }
    return
  }
  func.func @transform_0(%arg0: i32, %arg1: i32, %arg2: i32) -> i32 {
    %c0_i32 = arith.constant 0 : i32
    %c0_i32_0 = arith.constant 0 : i32
    return %c0_i32 : i32
  }
  func.func @transform_1(%arg0: i32, %arg1: i32, %arg2: i32) -> (i32, i32, i32) {
    %c0_i32 = arith.constant 0 : i32
    return %arg0, %arg1, %arg2 : i32, i32, i32
  }
  func.func @transform_2(%arg0: i32, %arg1: i32, %arg2: i32) -> (i32, i32) {
    %c0_i32 = arith.constant 0 : i32
    return %arg0, %arg1 : i32, i32
  }
}

</mosaic_0001>

<bundles_post_ra>
// kernel: tpu_custom_call.1
= control target key start
LH: loop header
LB: loop body
LE: loop exit
PB: predicated region body
PF: predicated region fallthrough
CT: control target
= control target key end

     0   :  { %8 = vsyncpa [#allocation5], 0  ;;  %s212_s0 = inlined_call_operand.<no memory space> [shape: f32[1], index: 0, kind: input, shape index: {}]   ;;  %s213_s1 = inlined_call_operand.hbm [shape: f32[2,4,256], index: 1, kind: input, shape index: {}]   ;;  %s214_s2 = inlined_call_operand.hbm [shape: f32[2,4], index: 2, kind: output, shape index: {}]  }
   0x1   :  { %9 = vsyncpa [#allocation6], 0  ;;  %s180_s9 = smov [#allocation4]  }
   0x2   :  { %s17_s10 = sshll.u32 %s180_s9, 4  ;;  %s18_s10 = int_to_ptr.vmem [resolvable:$true] %s17_s10 }
   0x3   :  { %s144_s11 = scalar_lea.vmem %s18_s10, 256  ;;  %p149_p1 = scmp.lt.s32.totalorder %s18_s10, %s18_s10 }
   0x4   :  { %p145_p0 = scmp.ne.s32.totalorder %s18_s10, %s144_s11  ;;  %p150_p2 = scmp.lt.s32.totalorder %s144_s11, %s144_s11 }
   0x6   :  { %p151_p3 = por %p150_p2, %p149_p1 }
   0x8   :  { %p152_p4 = pnand %p151_p3, %p145_p0 }
   0xa   :  { %155 = shalt.err (!%p152_p4)
}
   0xb   :  { %s181_s12 = smov 128   ;;  %s182_s13 = smov 8  }
   0xc   :  { %23 = dma.hbm_to_vmem [thread:$0]  %s213_s1, 256, %s18_s10, [#allocation5], %s181_s12, %s181_s12, %s182_s13  }
   0xd   :  { %176 = dma.done.wait [#allocation5], 256  }
   0xe   :  { %177 = vsyncadd [#allocation5], 4294967040  ;;  %v42_v0 = vstv %s212_s0  ;;  %v34_v1 = vld [vmem:[#allocation4] sm:$0xff]  ;;  %v35_v2 = vld [vmem:[#allocation4 + $0x8] sm:$0xff]  ;;  %vm56_vm0 = vcmask 1043456   ;;  %vm31_vm1 = vcmask 25600   ;;  %v69_v25 = vlaneseq }
   0xf   :  { %122 = vrcp.f32 %v42_v0  ;;  %v36_v3 = vmax.f32 %v34_v1, 1e-06  ;;  %v37_v4 = vmax.f32 %v35_v2, 1e-06  ;;  %v183_v24 = vmov 0.0   ;;  %s184_s1 = smov [#allocation7]  }
  0x10   :  { %32 = vst.msk [vmem:[#allocation2] sm:$0x3] %vm31_vm1, %v183_v24  ;;  %v70_v26 = vand.u32 127, %v69_v25  ;;  %v72_v27 = vshrl.u32 %v69_v25, 7  ;;  %vm79_vm2 = vcmask 1041409   ;;  %s106_s18 = sshll.u32 %s184_s1, 4  ;;  %s107_s18 = int_to_ptr.vmem [resolvable:$true] %s106_s18 }
  0x11   :  { %124 = vlog2.f32 %v36_v3  ;;  %s156_s19 = scalar_lea.vmem %s107_s18, 32  ;;  %p161_p6 = scmp.lt.s32.totalorder %s107_s18, %s107_s18 }
  0x12   :  { %126 = vlog2.f32 %v37_v4  ;;  %v73_v29 = vsub.s32 %v70_v26, %v72_v27  ;;  %p157_p5 = scmp.ne.s32.totalorder %s107_s18, %s156_s19  ;;  %p162_p7 = scmp.lt.s32.totalorder %s156_s19, %s156_s19 }
  0x14   :  { %p163_p8 = por %p162_p7, %p161_p6 }
  0x16   :  { %p164_p9 = pnand %p163_p8, %p157_p5 }
  0x17   :  { %v49_v33 = vld [vmem:[#allocation2] sm:$0x3] }
  0x1c   :  { %v123_v5 = vpop.eup %122 }
  0x1d   :  { %115 = vpush %v123_v5 }
  0x1e   :  { %v125_v6 = vpop.eup %124 }
  0x1f   :  { %v127_v7 = vpop.eup %126  ;;  %v39_v8 = vmul.f32 0.6931472, %v125_v6 }
  0x20   :  { %v41_v9 = vmul.f32 0.6931472, %v127_v7 }
  0x21   :  { %v43_v10 = vmul.f32 %v42_v0, %v39_v8 }
  0x22   :  { %v44_v11 = vmul.f32 %v42_v0, %v41_v9 }
  0x23   :  { %v45_v12 = vmul.f32 1.442695, %v43_v10 }
  0x24   :  { %v47_v13 = vmul.f32 1.442695, %v44_v11 }
  0x25   :  { %128 = vpow2.f32 %v45_v12 }
  0x26   :  { %130 = vpow2.f32 %v47_v13 }
  0x32   :  { %v129_v14 = vpop.eup %128 }
  0x33   :  { %v131_v15 = vpop.eup %130  ;;  %v52_v16 = vcombine.high %v129_v14, %v129_v14  ;;  %v57_v17 = vsel %vm56_vm0, %v129_v14, 0.0 }
  0x34   :  { %v53_v18 = vcombine.high %v131_v15, %v131_v15  ;;  %v62_v20 = vsel %vm56_vm0, %v131_v15, 0.0 }
  0x35   :  { %v58_v19 = vsel %vm56_vm0, %v52_v16, 0.0 }
  0x36   :  { %v59_v21 = vadd.f32 %v58_v19, %v57_v17  ;;  %v63_v22 = vsel %vm56_vm0, %v53_v18, 0.0 }
  0x37   :  { %v64_v23 = vadd.f32 %v63_v22, %v62_v20 }
  0x38   :  { %60 = vadd.xlane.f32.xlu0 %v59_v21 }
  0x3c   :  { %65 = vadd.xlane.f32.xlu0 %v64_v23 }
  0x4e   :  { %s116_s0 = spop %115 }
  0x4f   :  { %v95_v39 = vstv %s116_s0 }
  0xc1   :  { %v61_v28 = vpop.xlane.xlu0 %60 }
  0xc2   :  { %v74_v31 = vrot.slane %v61_v28, %v73_v29 }
  0xc5   :  { %v66_v30 = vpop.xlane.xlu0 %65 }
  0xc6   :  { %v78_v32 = vrot.slane %v66_v30, %v73_v29 }
  0xc8   :  { %v80_v34 = vsel %vm79_vm2, %v78_v32, %v74_v31 }
  0xc9   :  { %v82_v35 = vadd.f32 %v80_v34, %v49_v33 }
  0xcb   :  { %84 = vst.msk [vmem:[#allocation2] sm:$0x3] %vm31_vm1, %v82_v35 }
  0xd2   :  { %v88_v36 = vld [vmem:[#allocation2] sm:$0x3] }
  0xd3   :  { %v89_v37 = vmul.f32 0.00390625, %v88_v36 }
  0xd5   :  { %132 = vlog2.f32 %v89_v37 }
  0xe2   :  { %v133_v38 = vpop.eup %132 }
  0xe3   :  { %v91_v40 = vmul.f32 0.6931472, %v133_v38 }
  0xe5   :  { %v96_v41 = vmul.f32 %v95_v39, %v91_v40 }
  0xe7   :  { %v97_v42 = vmul.f32 1.442695, %v96_v41 }
  0xe9   :  { %134 = vpow2.f32 %v97_v42 }
  0xf6   :  { %v135_v43 = vpop.eup %134 }
  0xf7   :  { %99 = vst.msk [vmem:[#allocation7] sm:$0x3] %vm31_vm1, %v135_v43 }
  0xf8   :  { %167 = shalt.err (!%p164_p9)
}
  0xf9   :  { %109 = dma.vmem_to_hbm [thread:$0]  %s107_s18, 32, %s214_s2, [#allocation6]  }
  0xfa   :  { %178 = dma.done.wait [#allocation6], 32  }
  0xfb   :  { %179 = vsyncadd [#allocation6], 4294967264 }
  0xfc   :  { %113 = vsyncpa [#allocation5], 1 }
  0xfd   :  { %114 = vsyncpa [#allocation6], 1 }

</bundles_post_ra>
